<compile_context>
chip_gen: v6e
topology: v6e:2x2x1
jax: 0.10.0
libtpu: 0.0.40
codegen_flags: <defaults>
</compile_context>

<pallas_src>
import functools

import jax
import jax.numpy as jnp
from jax.experimental import pallas as pl
from jax.experimental.pallas import tpu as pltpu


def _round_up(x, m):
    return (x + m - 1) // m * m


# ----------------------------------------------------------------------------
# Kernels
# ----------------------------------------------------------------------------
def _fc_single_k_kernel(x_ref, w_ref, b_ref, o_ref):
    """Whole reduction in one shot: y = x @ W + b. No scratch, no pl.when."""
    o_ref[...] = (
        jnp.dot(x_ref[...], w_ref[...], preferred_element_type=jnp.float32)
        + b_ref[...]
    ).astype(o_ref.dtype)


def _fc_tiled_k_kernel(x_ref, w_ref, b_ref, o_ref, acc_ref, *, tk, x_is_resident):
    """One (N-tile, K-tile) step of y = x @ W + b with f32 accumulation.

    Grid is (grid_n, grid_k) with K (reduction) last.
    """
    k = pl.program_id(1)

    @pl.when(k == 0)
    def _():
        acc_ref[...] = jnp.zeros_like(acc_ref)

    if x_is_resident:
        # x is kept fully resident in VMEM; slice the current K chunk.
        start = pl.multiple_of(k * tk, 128)
        x_blk = x_ref[:, pl.ds(start, tk)]
    else:
        x_blk = x_ref[...]

    acc_ref[...] += jnp.dot(x_blk, w_ref[...], preferred_element_type=jnp.float32)

    @pl.when(k == pl.num_programs(1) - 1)
    def _():
        o_ref[...] = (acc_ref[...] + b_ref[...]).astype(o_ref.dtype)


# ----------------------------------------------------------------------------
# Wrapper
# ----------------------------------------------------------------------------
@functools.partial(jax.jit, static_argnames=("compute_dtype",))
def linear_pallas(x, w, b, *, compute_dtype=None):
    """y = x @ W + b.   x: (B, K), w: (K, N), b: (1, N)  ->  (B, N)."""
    B, K = x.shape
    Kw, N = w.shape
    assert Kw == K, "weight reduction dim must match flattened feature dim"
    out_dtype = x.dtype

    if compute_dtype is not None:
        # e.g. jnp.bfloat16 on v6e/v7x: halves dominant weight HBM traffic;
        # accumulation stays f32 via preferred_element_type in the kernel.
        x = x.astype(compute_dtype)
        w = w.astype(compute_dtype)

    itemsize = jnp.dtype(w.dtype).itemsize

    # ---- Lane-dense output: pad N to a multiple of 128 (vreg lane width). ----
    n_pad = _round_up(N, 128)
    # ---- N tiling (leading "parallel" axis; splits wide layers across TCs). --
    tn = n_pad if n_pad <= 2048 else 512
    n_pad = _round_up(n_pad, tn)
    if n_pad != N:
        w = jnp.pad(w, ((0, 0), (0, n_pad - N)))
        b = jnp.pad(b, ((0, 0), (0, n_pad - N)))
    grid_n = n_pad // tn

    # ---- K tiling: single shot unless double-buffered W tiles blow budget. ---
    w_tile_budget = 8 * 1024 * 1024  # bytes for 2x (tk, tn) W buffers
    if 2 * K * tn * itemsize <= w_tile_budget:
        tk = K
        k_pad = K
    else:
        tk = max(512, (w_tile_budget // (2 * tn * itemsize)) // 512 * 512)
        k_pad = _round_up(K, tk)
    if k_pad != K:
        # Zero padding along K does not change x @ W.
        x = jnp.pad(x, ((0, 0), (0, k_pad - K)))
        w = jnp.pad(w, ((0, k_pad - K), (0, 0)))
    grid_k = k_pad // tk

    out_shape = jax.ShapeDtypeStruct((B, n_pad), out_dtype)
    compiler_params_single = pltpu.CompilerParams(
        dimension_semantics=("parallel",),
        vmem_limit_bytes=32 * 1024 * 1024,
    )
    compiler_params_tiled = pltpu.CompilerParams(
        dimension_semantics=("parallel", "arbitrary"),
        vmem_limit_bytes=32 * 1024 * 1024,
    )

    if grid_k == 1:
        # Single K step: no accumulator, no init/finalize branches.
        y = pl.pallas_call(
            _fc_single_k_kernel,
            out_shape=out_shape,
            grid_spec=pltpu.PrefetchScalarGridSpec(
                num_scalar_prefetch=0,
                grid=(grid_n,),
                in_specs=[
                    pl.BlockSpec((B, k_pad), lambda j: (0, 0)),   # x resident
                    pl.BlockSpec((k_pad, tn), lambda j: (0, j)),  # W: N tile
                    pl.BlockSpec((1, tn), lambda j: (0, j)),      # bias: N tile
                ],
                out_specs=pl.BlockSpec((B, tn), lambda j: (0, j)),
            ),
            compiler_params=compiler_params_single,
        )(x, w, b)
    else:
        # Keep x resident across the K loop when it is small (single DMA
        # instead of grid_k tiny ones); otherwise slide it along K.
        x_resident = (B * k_pad * jnp.dtype(x.dtype).itemsize) <= 4 * 1024 * 1024
        if x_resident:
            x_spec = pl.BlockSpec((B, k_pad), lambda j, k: (0, 0))
        else:
            x_spec = pl.BlockSpec((B, tk), lambda j, k: (0, k))

        kernel = functools.partial(
            _fc_tiled_k_kernel, tk=tk, x_is_resident=x_resident
        )
        y = pl.pallas_call(
            kernel,
            out_shape=out_shape,
            grid_spec=pltpu.PrefetchScalarGridSpec(
                num_scalar_prefetch=0,
                grid=(grid_n, grid_k),
                in_specs=[
                    x_spec,
                    pl.BlockSpec((tk, tn), lambda j, k: (k, j)),  # W: K x N tile
                    pl.BlockSpec((1, tn), lambda j, k: (0, j)),   # bias: resident per N tile
                ],
                out_specs=pl.BlockSpec((B, tn), lambda j, k: (0, j)),
                scratch_shapes=[pltpu.VMEM((B, tn), jnp.float32)],
            ),
            compiler_params=compiler_params_tiled,
        )(x, w, b)

    # Slice off the lane padding.
    return y[:, :N]


def linear_wrapper_forward(x_nchw, w, b, *, compute_dtype=None):
    """LinearWrapper.forward: extractor (flatten) followed by fc (Pallas)."""
    # TODO(synk): the spec's `extractor` is an arbitrary nn.Module; a simple
    # row-major flatten is used here as the representative extractor.
    B = x_nchw.shape[0]
    feats = x_nchw.reshape(B, -1)
    return linear_pallas(feats, w, b, compute_dtype=compute_dtype)


if __name__ == "__main__":
    # Small, deterministic example consistent with the module:
    #   input x: (B=2, C=4, H=16, W=16)  ->  embedded_dim = 4*16*16 = 1024
    #   fc: Linear(embedded_dim=1024, out_dim=32, bias=True)
    B, C, H, W = 2, 4, 16, 16
    embedded_dim = C * H * W
    out_dim = 32

    key = jax.random.PRNGKey(0)
    kx, kw, kb = jax.random.split(key, 3)

    x = jax.random.normal(kx, (B, C, H, W), dtype=jnp.float32)

    # Deterministic nn.Linear-style init: U(-1/sqrt(in), 1/sqrt(in)).
    bound = 1.0 / (embedded_dim ** 0.5)
    w = jax.random.uniform(
        kw, (embedded_dim, out_dim), minval=-bound, maxval=bound,
        dtype=jnp.float32,
    )
    b = jax.random.uniform(
        kb, (1, out_dim), minval=-bound, maxval=bound, dtype=jnp.float32
    )

    out = linear_wrapper_forward(x, w, b)
    out = jax.block_until_ready(out)

    # Reference check in plain JAX (f32 path -> tight tolerance).
    ref = x.reshape(B, -1) @ w + b
    assert out.shape == (B, out_dim)
    assert jnp.allclose(out, ref, atol=1e-4, rtol=1e-4), "mismatch vs reference"

    # bf16-weights fast path (recommended on v6e/v7x) — looser tolerance.
    out_bf16 = jax.block_until_ready(
        linear_wrapper_forward(x, w, b, compute_dtype=jnp.bfloat16)
    )
    assert jnp.allclose(out_bf16, ref, atol=5e-2, rtol=5e-2), "bf16 path mismatch"

    print("KERNEL_OK")
</pallas_src>

<mosaic_0001>
module attributes {stable_mosaic.version = 11 : i64} {
  func.func @_fc_single_k_kernel(%arg0: i32, %arg1: memref<2x1024xf32, #tpu.memory_space<vmem>>, %arg2: memref<1024x128xf32, #tpu.memory_space<vmem>>, %arg3: memref<1x128xf32, #tpu.memory_space<vmem>>, %arg4: memref<2x128xf32, #tpu.memory_space<vmem>>) attributes {dimension_semantics = [#tpu.dimension_semantics<parallel>], iteration_bounds = array<i64: 1>, scalar_prefetch = 0 : i64, scratch_operands = 0 : i64, tpu.core_type = #tpu.core_type<tc>, window_params = [{pipeline_mode = #tpu.pipeline_mode<synchronous>, transform_indices = @transform_0, window_bounds = array<i64: 2, 1024>}, {transform_indices = @transform_1, window_bounds = array<i64: 1024, 128>}, {transform_indices = @transform_2, window_bounds = array<i64: 1, 128>}, {transform_indices = @transform_3, window_bounds = array<i64: 2, 128>}]} {
    %c0 = arith.constant 0 : index
    %c0_0 = arith.constant 0 : index
    %0 = vector.load %arg1[%c0, %c0_0] : memref<2x1024xf32, #tpu.memory_space<vmem>>, vector<2x1024xf32>
    %c0_1 = arith.constant 0 : index
    %c0_2 = arith.constant 0 : index
    %1 = vector.load %arg2[%c0_1, %c0_2] : memref<1024x128xf32, #tpu.memory_space<vmem>>, vector<1024x128xf32>
    %cst = arith.constant dense<0.000000e+00> : vector<2x128xf32>
    %2 = tpu.matmul %0, %1, %cst {dimension_numbers = #tpu.dot_dimension_numbers<[1], [0], [0], [1], [0, 0, 1, 1], [], []>} : vector<2x1024xf32>, vector<1024x128xf32>, vector<2x128xf32> -> vector<2x128xf32>
    %c0_3 = arith.constant 0 : index
    %c0_4 = arith.constant 0 : index
    %3 = vector.load %arg3[%c0_3, %c0_4] : memref<1x128xf32, #tpu.memory_space<vmem>>, vector<1x128xf32>
    %4 = vector.broadcast %3 : vector<1x128xf32> to vector<2x128xf32>
    %5 = arith.addf %2, %4 : vector<2x128xf32>
    %c0_5 = arith.constant 0 : index
    %c0_6 = arith.constant 0 : index
    %6 = vector.load %arg4[%c0_5, %c0_6] : memref<2x128xf32, #tpu.memory_space<vmem>>, vector<2x128xf32>
    tpu.vector_store %arg4[%c0_5, %c0_6], %5 {strides = array<i32>} : memref<2x128xf32, #tpu.memory_space<vmem>>, vector<2x128xf32>,
    return
  }
  func.func @transform_0(%arg0: i32) -> (i32, i32) {
    %c0_i32 = arith.constant 0 : i32
    %c0_i32_0 = arith.constant 0 : i32
    %c0_i32_1 = arith.constant 0 : i32
    return %c0_i32, %c0_i32_0 : i32, i32
  }
  func.func @transform_1(%arg0: i32) -> (i32, i32) {
    %c0_i32 = arith.constant 0 : i32
    %c0_i32_0 = arith.constant 0 : i32
    return %c0_i32, %arg0 : i32, i32
  }
  func.func @transform_2(%arg0: i32) -> (i32, i32) {
    %c0_i32 = arith.constant 0 : i32
    %c0_i32_0 = arith.constant 0 : i32
    return %c0_i32, %arg0 : i32, i32
  }
  func.func @transform_3(%arg0: i32) -> (i32, i32) {
    %c0_i32 = arith.constant 0 : i32
    %c0_i32_0 = arith.constant 0 : i32
    return %c0_i32, %arg0 : i32, i32
  }
}

</mosaic_0001>

<bundles_post_ra>
// kernel: linear_pallas.1
= control target key start
LH: loop header
LB: loop body
LE: loop exit
PB: predicated region body
PF: predicated region fallthrough
CT: control target
= control target key end

     0   :  { %v658_v30 = vmov 1983009808   ;;  %v158_v32 = vlaneseq  ;;  %s1082_s0 = inlined_call_operand.vmem [shape: f32[2,1024], index: 0, kind: input, shape index: {}]   ;;  %s1083_s1 = inlined_call_operand.vmem [shape: f32[1024,128], index: 1, kind: input, shape index: {}]   ;;  %s1084_s2 = inlined_call_operand.vmem [shape: f32[1,128], index: 2, kind: input, shape index: {}]   ;;  %s1085_s3 = inlined_call_operand.hbm [shape: f32[2,128], index: 3, kind: output, shape index: {}]  }
   0x1   :  { %v48_v0 = vld [vmem:[%s1083_s1 + $0xf8] sm:$0xff]  ;;  %v47_v4 = vld [vmem:[%s1083_s1 + $0xf0] sm:$0xff]  ;;  %v46_v8 = vld [vmem:[%s1083_s1 + $0xe8] sm:$0xff]  ;;  %v156_v31 = vunpack.c.l.s4 %v658_v30 }
   0x2   :  { %v80_v1 = vld [vmem:[%s1083_s1 + $0x1f8] sm:$0xff]  ;;  %492 = vmatprep.subr.mxu0 %v48_v0  ;;  %v79_v5 = vld [vmem:[%s1083_s1 + $0x1f0] sm:$0xff]  ;;  %v78_v9 = vld [vmem:[%s1083_s1 + $0x1e8] sm:$0xff]  ;;  %v159_v42 = vshrl.u32 %v158_v32, 7 }
   0x3   :  { %v32_v2 = vld [vmem:[%s1083_s1 + $0x78] sm:$0xff]  ;;  %527 = vmatprep.subr.mxu1 %v80_v1  ;;  %v31_v6 = vld [vmem:[%s1083_s1 + $0x70] sm:$0xff]  ;;  %v30_v10 = vld [vmem:[%s1083_s1 + $0x68] sm:$0xff]  ;;  %v157_v41 = vunpack.c.0.s8 %v156_v31 }
   0x4   :  { %v64_v3 = vld [vmem:[%s1083_s1 + $0x178] sm:$0xff]  ;;  %493 = vmatpush3.msra.mxu0 %v32_v2  ;;  %v63_v7 = vld [vmem:[%s1083_s1 + $0x170] sm:$0xff]  ;;  %v62_v11 = vld [vmem:[%s1083_s1 + $0x168] sm:$0xff] }
   0x5   :  { %528 = vmatpush3.msra.mxu1 %v64_v3  ;;  %494 = vmatprep.subr.mxu0 %v47_v4  ;;  %v45_v12 = vld [vmem:[%s1083_s1 + $0xe0] sm:$0xff]  ;;  %v44_v16 = vld [vmem:[%s1083_s1 + $0xd8] sm:$0xff]  ;;  %v43_v20 = vld [vmem:[%s1083_s1 + $0xd0] sm:$0xff]  ;;  %v818_v51 = vsub.s32 %v157_v41, %v159_v42 }
   0x6   :  { %529 = vmatprep.subr.mxu1 %v79_v5  ;;  %495 = vmatpush3.msra.mxu0 %v31_v6  ;;  %v77_v13 = vld [vmem:[%s1083_s1 + $0x1e0] sm:$0xff]  ;;  %v76_v17 = vld [vmem:[%s1083_s1 + $0x1d8] sm:$0xff]  ;;  %v75_v21 = vld [vmem:[%s1083_s1 + $0x1d0] sm:$0xff] }
   0x7   :  { %530 = vmatpush3.msra.mxu1 %v63_v7  ;;  %496 = vmatprep.subr.mxu0 %v46_v8  ;;  %v29_v14 = vld [vmem:[%s1083_s1 + $0x60] sm:$0xff]  ;;  %v28_v18 = vld [vmem:[%s1083_s1 + $0x58] sm:$0xff]  ;;  %v27_v22 = vld [vmem:[%s1083_s1 + $0x50] sm:$0xff] }
   0x8   :  { %531 = vmatprep.subr.mxu1 %v78_v9  ;;  %v61_v15 = vld [vmem:[%s1083_s1 + $0x160] sm:$0xff]  ;;  %497 = vmatpush3.msra.mxu0 %v30_v10  ;;  %v60_v19 = vld [vmem:[%s1083_s1 + $0x158] sm:$0xff]  ;;  %v59_v23 = vld [vmem:[%s1083_s1 + $0x150] sm:$0xff] }
   0x9   :  { %532 = vmatpush3.msra.mxu1 %v62_v11  ;;  %498 = vmatprep.subr.mxu0 %v45_v12  ;;  %v42_v24 = vld [vmem:[%s1083_s1 + $0xc8] sm:$0xff]  ;;  %v41_v28 = vld [vmem:[%s1083_s1 + $0xc0] sm:$0xff]  ;;  %v40_v35 = vld [vmem:[%s1083_s1 + $0xb8] sm:$0xff] }
   0xa   :  { %533 = vmatprep.subr.mxu1 %v77_v13  ;;  %499 = vmatpush3.msra.mxu0 %v29_v14  ;;  %v74_v25 = vld [vmem:[%s1083_s1 + $0x1c8] sm:$0xff]  ;;  %v73_v29 = vld [vmem:[%s1083_s1 + $0x1c0] sm:$0xff]  ;;  %v72_v36 = vld [vmem:[%s1083_s1 + $0x1b8] sm:$0xff] }
   0xb   :  { %534 = vmatpush3.msra.mxu1 %v61_v15  ;;  %500 = vmatprep.subr.mxu0 %v44_v16  ;;  %v26_v26 = vld [vmem:[%s1083_s1 + $0x48] sm:$0xff]  ;;  %v25_v33 = vld [vmem:[%s1083_s1 + $0x40] sm:$0xff]  ;;  %v24_v37 = vld [vmem:[%s1083_s1 + $0x38] sm:$0xff] }
   0xc   :  { %535 = vmatprep.subr.mxu1 %v76_v17  ;;  %501 = vmatpush3.msra.mxu0 %v28_v18  ;;  %v58_v27 = vld [vmem:[%s1083_s1 + $0x148] sm:$0xff]  ;;  %v57_v34 = vld [vmem:[%s1083_s1 + $0x140] sm:$0xff]  ;;  %v56_v38 = vld [vmem:[%s1083_s1 + $0x138] sm:$0xff] }
   0xd   :  { %536 = vmatpush3.msra.mxu1 %v60_v19  ;;  %502 = vmatprep.subr.mxu0 %v43_v20  ;;  %v39_v39 = vld [vmem:[%s1083_s1 + $0xb0] sm:$0xff]  ;;  %v38_v45 = vld [vmem:[%s1083_s1 + $0xa8] sm:$0xff]  ;;  %v37_v49 = vld [vmem:[%s1083_s1 + $0xa0] sm:$0xff] }
   0xe   :  { %537 = vmatprep.subr.mxu1 %v75_v21  ;;  %503 = vmatpush3.msra.mxu0 %v27_v22  ;;  %v71_v40 = vld [vmem:[%s1083_s1 + $0x1b0] sm:$0xff]  ;;  %v70_v46 = vld [vmem:[%s1083_s1 + $0x1a8] sm:$0xff]  ;;  %v69_v50 = vld [vmem:[%s1083_s1 + $0x1a0] sm:$0xff] }
   0xf   :  { %538 = vmatpush3.msra.mxu1 %v59_v23  ;;  %504 = vmatprep.subr.mxu0 %v42_v24  ;;  %v23_v43 = vld [vmem:[%s1083_s1 + $0x30] sm:$0xff]  ;;  %v22_v47 = vld [vmem:[%s1083_s1 + $0x28] sm:$0xff]  ;;  %v21_v52 = vld [vmem:[%s1083_s1 + $0x20] sm:$0xff] }
  0x10   :  { %539 = vmatprep.subr.mxu1 %v74_v25  ;;  %505 = vmatpush3.msra.mxu0 %v26_v26  ;;  %v55_v44 = vld [vmem:[%s1083_s1 + $0x130] sm:$0xff]  ;;  %v54_v48 = vld [vmem:[%s1083_s1 + $0x128] sm:$0xff]  ;;  %v53_v53 = vld [vmem:[%s1083_s1 + $0x120] sm:$0xff] }
  0x11   :  { %540 = vmatpush3.msra.mxu1 %v58_v27  ;;  %506 = vmatprep.subr.mxu0 %v41_v28  ;;  %v15_v54 = vld [vmem:[%s1082_s0] sm:$0xff]  ;;  %v36_v55 = vld [vmem:[%s1083_s1 + $0x98] sm:$0xff]  ;;  %v35_v60 = vld [vmem:[%s1083_s1 + $0x90] sm:$0xff] }
  0x12   :  { %541 = vmatprep.subr.mxu1 %v73_v29  ;;  %507 = vmatpush3.msra.mxu0 %v25_v33  ;;  %v68_v56 = vld [vmem:[%s1083_s1 + $0x198] sm:$0xff]  ;;  %v154_v57 = vcombine.high %v15_v54, %v15_v54  ;;  %v67_v61 = vld [vmem:[%s1083_s1 + $0x190] sm:$0xff]  ;;  %v161_v62 = vrot.slane %v15_v54, %v818_v51  ;;  %v34_v1 = vld [vmem:[%s1083_s1 + $0x88] sm:$0xff] }
  0x13   :  { %542 = vmatpush3.msra.mxu1 %v57_v34  ;;  %508 = vmatprep.subr.mxu0 %v40_v35  ;;  %v20_v58 = vld [vmem:[%s1083_s1 + $0x18] sm:$0xff]  ;;  %v19_v63 = vld [vmem:[%s1083_s1 + $0x10] sm:$0xff]  ;;  %v66_v2 = vld [vmem:[%s1083_s1 + $0x188] sm:$0xff] }
  0x14   :  { %543 = vmatprep.subr.mxu1 %v72_v36  ;;  %509 = vmatpush3.msra.mxu0 %v24_v37  ;;  %v52_v59 = vld [vmem:[%s1083_s1 + $0x118] sm:$0xff]  ;;  %v51_v0 = vld [vmem:[%s1083_s1 + $0x110] sm:$0xff]  ;;  %v168_v3 = vrot.slane %v154_v57, %v818_v51  ;;  %v18_v4 = vld [vmem:[%s1083_s1 + $0x8] sm:$0xff]  ;;  %v169_v8 = vcombine.high %v161_v62, %v161_v62 }
  0x15   :  { %544 = vmatpush3.msra.mxu1 %v56_v38  ;;  %510 = vmatprep.subr.mxu0 %v39_v39  ;;  %v50_v5 = vld [vmem:[%s1083_s1 + $0x108] sm:$0xff]  ;;  %v33_v6 = vld [vmem:[%s1083_s1 + $0x80] sm:$0xff]  ;;  %v112_v12 = vld [vmem:[%s1083_s1 + $0x2f8] sm:$0xff] }
  0x16   :  { %545 = vmatprep.subr.mxu1 %v71_v40  ;;  %511 = vmatpush3.msra.mxu0 %v23_v43  ;;  %v65_v7 = vld [vmem:[%s1083_s1 + $0x180] sm:$0xff]  ;;  %v170_v11 = vcombine.high %v168_v3, %v168_v3  ;;  %v144_v13 = vld [vmem:[%s1083_s1 + $0x3f8] sm:$0xff]  ;;  %v111_v16 = vld [vmem:[%s1083_s1 + $0x2f0] sm:$0xff] }
  0x17   :  { %546 = vmatpush3.msra.mxu1 %v55_v44  ;;  %512 = vmatprep.subr.mxu0 %v38_v45  ;;  %v17_v9 = vld [vmem:[%s1083_s1] sm:$0xff]  ;;  %v96_v14 = vld [vmem:[%s1083_s1 + $0x278] sm:$0xff]  ;;  %v143_v17 = vld [vmem:[%s1083_s1 + $0x3f0] sm:$0xff] }
  0x18   :  { %547 = vmatprep.subr.mxu1 %v70_v46  ;;  %513 = vmatpush3.msra.mxu0 %v22_v47  ;;  %v49_v10 = vld [vmem:[%s1083_s1 + $0x100] sm:$0xff]  ;;  %v128_v15 = vld [vmem:[%s1083_s1 + $0x378] sm:$0xff]  ;;  %v95_v18 = vld [vmem:[%s1083_s1 + $0x270] sm:$0xff] }
  0x19   :  { %548 = vmatpush3.msra.mxu1 %v54_v48  ;;  %514 = vmatprep.subr.mxu0 %v37_v49  ;;  %v127_v19 = vld [vmem:[%s1083_s1 + $0x370] sm:$0xff]  ;;  %v110_v20 = vld [vmem:[%s1083_s1 + $0x2e8] sm:$0xff]  ;;  %v109_v24 = vld [vmem:[%s1083_s1 + $0x2e0] sm:$0xff] }
  0x1a   :  { %549 = vmatprep.subr.mxu1 %v69_v50  ;;  %515 = vmatpush3.msra.mxu0 %v21_v52  ;;  %v142_v21 = vld [vmem:[%s1083_s1 + $0x3e8] sm:$0xff]  ;;  %v141_v25 = vld [vmem:[%s1083_s1 + $0x3e0] sm:$0xff]  ;;  %v108_v28 = vld [vmem:[%s1083_s1 + $0x2d8] sm:$0xff] }
  0x1b   :  { %550 = vmatpush3.msra.mxu1 %v53_v53  ;;  %516 = vmatprep.subr.mxu0 %v36_v55  ;;  %v94_v22 = vld [vmem:[%s1083_s1 + $0x268] sm:$0xff]  ;;  %v93_v26 = vld [vmem:[%s1083_s1 + $0x260] sm:$0xff]  ;;  %v140_v29 = vld [vmem:[%s1083_s1 + $0x3d8] sm:$0xff] }
  0x1c   :  { %551 = vmatprep.subr.mxu1 %v68_v56  ;;  %517 = vmatpush3.msra.mxu0 %v20_v58  ;;  %v126_v23 = vld [vmem:[%s1083_s1 + $0x368] sm:$0xff]  ;;  %v125_v27 = vld [vmem:[%s1083_s1 + $0x360] sm:$0xff]  ;;  %v92_v30 = vld [vmem:[%s1083_s1 + $0x258] sm:$0xff] }
  0x1d   :  { %552 = vmatpush3.msra.mxu1 %v52_v59  ;;  %518 = vmatprep.subr.mxu0 %v35_v60  ;;  %v124_v31 = vld [vmem:[%s1083_s1 + $0x358] sm:$0xff]  ;;  %v107_v32 = vld [vmem:[%s1083_s1 + $0x2d0] sm:$0xff] }
  0x1e   :  { %553 = vmatprep.subr.mxu1 %v67_v61  ;;  %519 = vmatpush3.msra.mxu0 %v19_v63  ;;  %v139_v33 = vld [vmem:[%s1083_s1 + $0x3d0] sm:$0xff] }
  0x1f   :  { %554 = vmatpush3.msra.mxu1 %v51_v0  ;;  %520 = vmatprep.subr.mxu0 %v34_v1  ;;  %v91_v34 = vld [vmem:[%s1083_s1 + $0x250] sm:$0xff] }
  0x20   :  { %555 = vmatprep.subr.mxu1 %v66_v2  ;;  %521 = vmatpush3.msra.mxu0 %v18_v4  ;;  %v123_v35 = vld [vmem:[%s1083_s1 + $0x350] sm:$0xff] }
  0x21   :  { %556 = vmatpush3.msra.mxu1 %v50_v5  ;;  %522 = vmatprep.subr.mxu0 %v33_v6 }
  0x22   :  { %557 = vmatprep.subr.mxu1 %v65_v7  ;;  %523 = vmatpush3.msra.mxu0 %v17_v9 }
  0x23   :  { %260 = vmatprep.mubr.f32.mxu0 %v169_v8  ;;  %558 = vmatpush3.msra.mxu1 %v49_v10 }
  0x24   :  { %261 = vmatmul.mubr.f32.vlgmr.msra.gmra.mxu0 %v161_v62  ;;  %330 = vmatprep.mubr.f32.mxu1 %v170_v11 }
  0x25   :  { %562 = vmatprep.subr.mxu0 %v112_v12  ;;  %597 = vmatprep.subr.mxu1 %v144_v13 }
  0x26   :  { %331 = vmatmul.mubr.f32.vlgmr.msra.gmra.mxu1 %v168_v3  ;;  %563 = vmatpush3.msra.mxu0 %v96_v14 }
  0x27   :  { %598 = vmatpush3.msra.mxu1 %v128_v15  ;;  %564 = vmatprep.subr.mxu0 %v111_v16 }
  0x28   :  { %599 = vmatprep.subr.mxu1 %v143_v17  ;;  %565 = vmatpush3.msra.mxu0 %v95_v18 }
  0x29   :  { %600 = vmatpush3.msra.mxu1 %v127_v19  ;;  %566 = vmatprep.subr.mxu0 %v110_v20 }
  0x2a   :  { %601 = vmatprep.subr.mxu1 %v142_v21  ;;  %567 = vmatpush3.msra.mxu0 %v94_v22 }
  0x2b   :  { %602 = vmatpush3.msra.mxu1 %v126_v23  ;;  %568 = vmatprep.subr.mxu0 %v109_v24 }
  0x2c   :  { %603 = vmatprep.subr.mxu1 %v141_v25  ;;  %569 = vmatpush3.msra.mxu0 %v93_v26 }
  0x2d   :  { %604 = vmatpush3.msra.mxu1 %v125_v27  ;;  %570 = vmatprep.subr.mxu0 %v108_v28 }
  0x2e   :  { %605 = vmatprep.subr.mxu1 %v140_v29 }
  0x2f   :  { %8 = vsyncpa [#allocation3], 0  ;;  %571 = vmatpush3.msra.mxu0 %v92_v30  ;;  %606 = vmatpush3.msra.mxu1 %v124_v31  ;;  %v106_v36 = vld [vmem:[%s1083_s1 + $0x2c8] sm:$0xff]  ;;  %v105_v40 = vld [vmem:[%s1083_s1 + $0x2c0] sm:$0xff] }
  0x30   :  { %v138_v37 = vld [vmem:[%s1083_s1 + $0x3c8] sm:$0xff]  ;;  %572 = vmatprep.subr.mxu0 %v107_v32  ;;  %607 = vmatprep.subr.mxu1 %v139_v33  ;;  %v137_v41 = vld [vmem:[%s1083_s1 + $0x3c0] sm:$0xff]  ;;  %v104_v44 = vld [vmem:[%s1083_s1 + $0x2b8] sm:$0xff] }
  0x31   :  { %v90_v38 = vld [vmem:[%s1083_s1 + $0x248] sm:$0xff]  ;;  %573 = vmatpush3.msra.mxu0 %v91_v34  ;;  %608 = vmatpush3.msra.mxu1 %v123_v35  ;;  %v89_v42 = vld [vmem:[%s1083_s1 + $0x240] sm:$0xff]  ;;  %v136_v45 = vld [vmem:[%s1083_s1 + $0x3b8] sm:$0xff] }
  0x32   :  { %v122_v39 = vld [vmem:[%s1083_s1 + $0x348] sm:$0xff]  ;;  %574 = vmatprep.subr.mxu0 %v106_v36  ;;  %609 = vmatprep.subr.mxu1 %v138_v37  ;;  %v121_v43 = vld [vmem:[%s1083_s1 + $0x340] sm:$0xff]  ;;  %v88_v46 = vld [vmem:[%s1083_s1 + $0x238] sm:$0xff] }
  0x33   :  { %575 = vmatpush3.msra.mxu0 %v90_v38  ;;  %610 = vmatpush3.msra.mxu1 %v122_v39  ;;  %v120_v47 = vld [vmem:[%s1083_s1 + $0x338] sm:$0xff]  ;;  %v103_v48 = vld [vmem:[%s1083_s1 + $0x2b0] sm:$0xff]  ;;  %v102_v53 = vld [vmem:[%s1083_s1 + $0x2a8] sm:$0xff] }
  0x34   :  { %576 = vmatprep.subr.mxu0 %v105_v40  ;;  %611 = vmatprep.subr.mxu1 %v137_v41  ;;  %v135_v49 = vld [vmem:[%s1083_s1 + $0x3b0] sm:$0xff]  ;;  %v134_v54 = vld [vmem:[%s1083_s1 + $0x3a8] sm:$0xff]  ;;  %v101_v58 = vld [vmem:[%s1083_s1 + $0x2a0] sm:$0xff] }
  0x35   :  { %577 = vmatpush3.msra.mxu0 %v89_v42  ;;  %612 = vmatpush3.msra.mxu1 %v121_v43  ;;  %v87_v50 = vld [vmem:[%s1083_s1 + $0x230] sm:$0xff]  ;;  %v16_v55 = vld [vmem:[%s1082_s0 + $0x8] sm:$0xff]  ;;  %v133_v59 = vld [vmem:[%s1083_s1 + $0x3a0] sm:$0xff] }
  0x36   :  { %578 = vmatprep.subr.mxu0 %v104_v44  ;;  %613 = vmatprep.subr.mxu1 %v136_v45  ;;  %v119_v52 = vld [vmem:[%s1083_s1 + $0x330] sm:$0xff]  ;;  %v86_v56 = vld [vmem:[%s1083_s1 + $0x228] sm:$0xff]  ;;  %v85_v60 = vld [vmem:[%s1083_s1 + $0x220] sm:$0xff]  ;;  %v171_v62 = vcombine.high %v16_v55, %v16_v55  ;;  %v178_v5 = vrot.slane %v16_v55, %v818_v51 }
  0x37   :  { %579 = vmatpush3.msra.mxu0 %v88_v46  ;;  %614 = vmatpush3.msra.mxu1 %v120_v47  ;;  %v118_v57 = vld [vmem:[%s1083_s1 + $0x328] sm:$0xff]  ;;  %v117_v61 = vld [vmem:[%s1083_s1 + $0x320] sm:$0xff]  ;;  %v100_v63 = vld [vmem:[%s1083_s1 + $0x298] sm:$0xff] }
  0x38   :  { %580 = vmatprep.subr.mxu0 %v103_v48  ;;  %615 = vmatprep.subr.mxu1 %v135_v49  ;;  %v132_v0 = vld [vmem:[%s1083_s1 + $0x398] sm:$0xff]  ;;  %v99_v3 = vld [vmem:[%s1083_s1 + $0x290] sm:$0xff]  ;;  %v185_v8 = vrot.slane %v171_v62, %v818_v51  ;;  %v98_v9 = vld [vmem:[%s1083_s1 + $0x288] sm:$0xff]  ;;  %v186_v14 = vcombine.high %v178_v5, %v178_v5 }
  0x39   :  { %581 = vmatpush3.msra.mxu0 %v87_v50  ;;  %616 = vmatpush3.msra.mxu1 %v119_v52  ;;  %v84_v1 = vld [vmem:[%s1083_s1 + $0x218] sm:$0xff]  ;;  %v131_v4 = vld [vmem:[%s1083_s1 + $0x390] sm:$0xff]  ;;  %v130_v10 = vld [vmem:[%s1083_s1 + $0x388] sm:$0xff] }
  0x3a   :  { %582 = vmatprep.subr.mxu0 %v102_v53  ;;  %617 = vmatprep.subr.mxu1 %v134_v54  ;;  %v116_v2 = vld [vmem:[%s1083_s1 + $0x318] sm:$0xff]  ;;  %v83_v6 = vld [vmem:[%s1083_s1 + $0x210] sm:$0xff]  ;;  %v82_v11 = vld [vmem:[%s1083_s1 + $0x208] sm:$0xff]  ;;  %v187_v16 = vcombine.high %v185_v8, %v185_v8 }
  0x3b   :  { %583 = vmatpush3.msra.mxu0 %v86_v56  ;;  %618 = vmatpush3.msra.mxu1 %v118_v57  ;;  %v115_v7 = vld [vmem:[%s1083_s1 + $0x310] sm:$0xff]  ;;  %v114_v51 = vld [vmem:[%s1083_s1 + $0x308] sm:$0xff]  ;;  %v97_v12 = vld [vmem:[%s1083_s1 + $0x280] sm:$0xff] }
  0x3c   :  { %584 = vmatprep.subr.mxu0 %v101_v58  ;;  %619 = vmatprep.subr.mxu1 %v133_v59  ;;  %v129_v13 = vld [vmem:[%s1083_s1 + $0x380] sm:$0xff] }
  0x3d   :  { %585 = vmatpush3.msra.mxu0 %v85_v60  ;;  %620 = vmatpush3.msra.mxu1 %v117_v61  ;;  %v81_v15 = vld [vmem:[%s1083_s1 + $0x200] sm:$0xff] }
  0x3e   :  { %586 = vmatprep.subr.mxu0 %v100_v63  ;;  %621 = vmatprep.subr.mxu1 %v132_v0  ;;  %v113_v17 = vld [vmem:[%s1083_s1 + $0x300] sm:$0xff]  ;;  %s659_s1 = smov [#allocation2]  }
  0x3f   :  { %587 = vmatpush3.msra.mxu0 %v84_v1  ;;  %622 = vmatpush3.msra.mxu1 %v116_v2  ;;  %v491_v22 = vld [vmem:[%s1084_s2] ss:$0 sm:$0xff]  ;;  %s483_s29 = sshll.u32 %s659_s1, 4  ;;  %s484_s29 = int_to_ptr.vmem [resolvable:$true] %s483_s29 }
  0x40   :  { %588 = vmatprep.subr.mxu0 %v99_v3  ;;  %623 = vmatprep.subr.mxu1 %v131_v4  ;;  %s636_s30 = scalar_lea.vmem %s484_s29, 32  ;;  %p641_p1 = scmp.lt.s32.totalorder %s484_s29, %s484_s29 }
  0x41   :  { %589 = vmatpush3.msra.mxu0 %v83_v6  ;;  %624 = vmatpush3.msra.mxu1 %v115_v7  ;;  %p637_p0 = scmp.ne.s32.totalorder %s484_s29, %s636_s30  ;;  %p642_p2 = scmp.lt.s32.totalorder %s636_s30, %s636_s30 }
  0x42   :  { %590 = vmatprep.subr.mxu0 %v98_v9  ;;  %625 = vmatprep.subr.mxu1 %v130_v10 }
  0x43   :  { %591 = vmatpush3.msra.mxu0 %v82_v11  ;;  %626 = vmatpush3.msra.mxu1 %v114_v51  ;;  %p643_p3 = por %p642_p2, %p641_p1 }
  0x44   :  { %592 = vmatprep.subr.mxu0 %v97_v12  ;;  %627 = vmatprep.subr.mxu1 %v129_v13 }
  0x45   :  { %593 = vmatpush3.msra.mxu0 %v81_v15  ;;  %400 = vmatprep.mubr.f32.mxu0 %v186_v14  ;;  %p644_p4 = pnand %p643_p3, %p637_p0 }
  0x46   :  { %628 = vmatpush3.msra.mxu1 %v113_v17  ;;  %470 = vmatprep.mubr.f32.mxu1 %v187_v16 }
  0x47   :  { %401 = vmatmul.mubr.f32.vlgmr.msra.gmra.mxu0 %v178_v5  ;;  %471 = vmatmul.mubr.f32.vlgmr.msra.gmra.mxu1 %v185_v8 }
  0xe4   :  { %v524_v18 = vpop.f32.mrf.mxu0 }
  0xe6   :  { %v559_v19 = vpop.f32.mrf.mxu1  ;;  %v525_v20 = vpop.f32.mrf.mxu0 }
  0xe7   :  { %v526_v21 = vadd.f32 %v525_v20, %v524_v18 }
  0xe8   :  { %v560_v23 = vpop.f32.mrf.mxu1 }
  0xe9   :  { %v263_v24 = vadd.f32 %v526_v21, %v491_v22  ;;  %v561_v25 = vadd.f32 %v560_v23, %v559_v19 }
  0xeb   :  { %v333_v30 = vadd.f32 %v561_v25, %v263_v24 }
 0x107   :  { %v594_v26 = vpop.f32.mrf.mxu0  ;;  %v629_v27 = vpop.f32.mrf.mxu1 }
 0x109   :  { %v595_v28 = vpop.f32.mrf.mxu0  ;;  %v630_v29 = vpop.f32.mrf.mxu1 }
 0x10a   :  { %v596_v31 = vadd.f32 %v595_v28, %v594_v26  ;;  %v631_v33 = vadd.f32 %v630_v29, %v629_v27 }
 0x10c   :  { %v403_v32 = vadd.f32 %v596_v31, %v333_v30 }
 0x10e   :  { %v473_v34 = vadd.f32 %v631_v33, %v403_v32 }
 0x110   :  { %476 = vst [vmem:[#allocation2] sm:$0x3] %v473_v34 }
 0x111   :  { %647 = shalt.err (!%p644_p4)
}
 0x112   :  { %486 = dma.vmem_to_hbm [thread:$0]  %s484_s29, 32, %s1085_s3, [#allocation3]  }
 0x113   :  { %656 = dma.done.wait [#allocation3], 32  }
 0x114   :  { %657 = vsyncadd [#allocation3], 4294967264 }
 0x115   :  { %490 = vsyncpa [#allocation3], 1 }

</bundles_post_ra>
